<compile_context>
chip_gen: v7x
topology: tpu7x:2x2x1
jax: 0.10.0
libtpu: 0.0.40
codegen_flags: <defaults>
</compile_context>

<pallas_src>
import functools
import math

import numpy as np

import jax
import jax.numpy as jnp
from jax import lax
from jax.experimental import pallas as pl
from jax.experimental.pallas import tpu as pltpu  # noqa: F401

# ---- small, module-consistent shapes ----
B = 4              # batch
S = 8              # caption (sequence) length
D = 128            # embedding dim (lane-dense; PromptLearner dim)
T = 4              # num prompt tokens (opt.num_tokens)
H = 8              # MultiheadAttention heads
DH = D // H        # head dim (16)
VOCAB = 100
C, IH, IW = 3, 8, 8
F_IMG = C * IH * IW   # 192

N = B * S          # flattened key/value rows   (32)
R = B * T          # flattened query rows       (16)

# layout assumptions the masks/index math rely on (review: add static asserts)
assert D % H == 0 and N == B * S and R == B * T and H * R == 128


# --------------------------------------------------------------------------
# Fused kernel: img_enc stub + txt_enc masked-means + PromptLearner MHA
#               (+residual, +token-mean) + forward_sim + cosine distill loss
# --------------------------------------------------------------------------
def _vse_fused_kernel(word_ref, long_ref, len_s_ref, len_l_ref, img_ref,
                      img_w_ref, img_b_ref, qm_ref, wkv_ref, bkv_ref,
                      wo_ref, shift_ref, hmask_ref, sbias_ref, collapse_ref,
                      out_ref, *, no_res_embed):
    f32 = jnp.float32

    # ---------- encoder stubs, fused (gathers stay outside) ----------
    # image encoder stub: (B, F) @ (F, D) linear
    img_emb = jnp.dot(img_ref[...], img_w_ref[...],
                      preferred_element_type=f32) + img_b_ref[...]      # (B, D)

    # text encoder stub: length-masked mean over word embeddings, expressed as
    # a tiny (B, N) pooling matmul built in-kernel from the lengths.
    col = lax.broadcasted_iota(jnp.int32, (B, N), 1)
    row = lax.broadcasted_iota(jnp.int32, (B, N), 0)
    start = row * S

    def masked_mean(words, lens_i32):
        valid = (col >= start) & (col < start + lens_i32)               # (B, N)
        pool = valid.astype(f32) / lens_i32.astype(f32)                 # (B, N)
        return jnp.dot(pool, words, preferred_element_type=f32)         # (B, D)

    word = word_ref[...]                                                # (N, D)
    cap_txt = masked_mean(word, len_s_ref[...])                         # student caption emb
    long_emb = masked_mean(long_ref[...], len_l_ref[...])               # frozen teacher emb

    # ---------- PromptLearner cross-attention ----------
    # K/V projection: one (N, D) @ (D, 2D) matmul, packed [Wk^T | Wv^T].
    kv = jnp.dot(word, wkv_ref[...], preferred_element_type=f32) + bkv_ref[...]
    k = kv[:, :D]                                                       # (N, D)
    v = kv[:, D:]                                                       # (N, D)

    # qm_ref = pre-scaled, head-masked, (h,b,t)-tiled queries (constant), so a
    # single full-width (K = D) matmul yields every per-head score.
    s = lax.dot_general(qm_ref[...], k, (((1,), (1,)), ((), ())),
                        preferred_element_type=f32)                     # (H*R, N)
    s = s + sbias_ref[...]                   # -1e30 on cross-batch keys
    m = jnp.max(s, axis=-1, keepdims=True)   # max over the row's own keys only
    e = jnp.exp(s - m)
    a = e * pl.reciprocal(jnp.sum(e, axis=-1, keepdims=True))  # exact recip

    # readout; heads re-concatenated via the lane head mask, then token mean +
    # batch collapse folded into ONE (B, H*R) matmul BEFORE the out-projection.
    attn = jnp.dot(a, v, preferred_element_type=f32) * hmask_ref[...]   # (H*R, D)
    pooled = jnp.dot(collapse_ref[...], attn, preferred_element_type=f32)  # (B, D)
    # shift = out-proj bias + mean(prompt_tokens): residual + token-mean folded
    prompt_emb = jnp.dot(pooled, wo_ref[...],
                         preferred_element_type=f32) + shift_ref[...]   # (B, D)

    # NOTE: polarity matches the reference forward(): the residual is added
    # exactly when opt.no_res_embed is True (counter-intuitive but per spec).
    cap_emb = cap_txt + prompt_emb if no_res_embed else prompt_emb

    # ---------- forward_sim: l2norm (eps=1e-8, added to the sqrt) ----------
    img_ss = jnp.sum(img_emb * img_emb, axis=-1, keepdims=True)
    cap_ss = jnp.sum(cap_emb * cap_emb, axis=-1, keepdims=True)
    img_n = img_emb / (jnp.sqrt(img_ss) + 1e-8)
    cap_n = cap_emb / (jnp.sqrt(cap_ss) + 1e-8)
    sims = lax.dot_general(img_n, cap_n, (((1,), (1,)), ((), ())),
                           preferred_element_type=f32)                  # (B, B)

    # ---------- cosine distillation loss (reference norm has no eps) ----------
    long_ss = jnp.sum(long_emb * long_emb, axis=-1, keepdims=True)
    cos = jnp.sum((cap_emb * lax.rsqrt(cap_ss)) * (long_emb * lax.rsqrt(long_ss)),
                  axis=-1, keepdims=True)                               # (B, 1)
    loss_val = 1.0 - jnp.sum(cos, keepdims=True) * (1.0 / B)            # (1, 1)

    # single packed output: rows 0..B-1 = sims, row B = distill loss
    out_ref[0:B, :] = sims
    out_ref[B:B + 1, :] = jnp.broadcast_to(loss_val, (1, B))


# --------------------------------------------------------------------------
# One-time parameter preparation (outside jit) and the jit'd forward
# --------------------------------------------------------------------------
def prepare_kernel_params(p):
    """Parameter-derived tensors computed ONCE outside jit and passed as
    constants (per perf review: remove per-call wrapper dispatches)."""
    scale = 1.0 / math.sqrt(DH)                      # nn.MultiheadAttention q-scale
    # batch-independent, pre-scaled query projection of the prompt tokens
    q = (p["prompt_tokens"] @ p["wq"].T + p["bq"][None, :]) * scale     # (T, D)

    rows = np.arange(H * R)
    h_of = rows // R                 # head of each score row
    b_of = (rows % R) // T           # batch of each score row
    t_of = rows % T                  # prompt token of each score row
    hmask = (np.arange(D)[None, :] // DH == h_of[:, None]).astype(np.float32)   # (H*R, D)
    score_bias = np.where(np.arange(N)[None, :] // S == b_of[:, None],
                          0.0, -1e30).astype(np.float32)                        # (H*R, N)
    collapse = (b_of[None, :] == np.arange(B)[:, None]).astype(np.float32) / T  # (B, H*R)
    q_masked = q[t_of, :] * jnp.asarray(hmask)                                  # (H*R, D)

    return {
        "embed": p["embed"],
        "img_w": p["img_w"],
        "img_b": p["img_b"][None, :],
        "q_masked": q_masked,
        "w_kv": jnp.concatenate([p["wk"].T, p["wv"].T], axis=1),        # (D, 2D)
        "b_kv": jnp.concatenate([p["bk"], p["bv"]])[None, :],           # (1, 2D)
        "wo_t": p["wo"].T,                                              # (D, D)
        "shift": (p["bo"] + jnp.mean(p["prompt_tokens"], axis=0))[None, :],
        "hmask": jnp.asarray(hmask),
        "score_bias": jnp.asarray(score_bias),
        "collapse": jnp.asarray(collapse),
    }


@functools.partial(jax.jit, static_argnames=("no_res_embed",))
def vse_forward(kp, images, captions, lengths, long_captions, long_lengths,
                warmup_alpha=1.0, no_res_embed=False):
    # TODO(synk): get_image_encoder/get_text_encoder are external; linear /
    # embedding + masked-mean stubs are used, with everything except the
    # embedding gathers fused into the Pallas kernel below.
    word = kp["embed"][captions].reshape(N, D)                           # (B*S, D)
    long_word = lax.stop_gradient(kp["embed"][long_captions]).reshape(N, D)

    kernel = functools.partial(_vse_fused_kernel, no_res_embed=no_res_embed)
    packed = pl.pallas_call(
        kernel,
        out_shape=jax.ShapeDtypeStruct((B + 1, B), jnp.float32),
    )(word, long_word,
      lengths.reshape(B, 1).astype(jnp.int32),
      long_lengths.reshape(B, 1).astype(jnp.int32),
      images.reshape(B, -1),
      kp["img_w"], kp["img_b"], kp["q_masked"], kp["w_kv"], kp["b_kv"],
      kp["wo_t"], kp["shift"], kp["hmask"], kp["score_bias"], kp["collapse"])

    sims = packed[:B, :B]
    distill_loss = packed[B, 0]
    # TODO(synk): criterion = loss_select(opt, opt.loss) is external; align loss stubbed to 0.
    align_loss = jnp.float32(0.0) * warmup_alpha
    return align_loss + distill_loss, sims


# --------------------------------------------------------------------------
# Deterministic parameter init (no checkpoint loading — TODO(synk): torch.load)
# --------------------------------------------------------------------------
def init_params(key):
    ks = jax.random.split(key, 8)
    sd = 1.0 / math.sqrt(D)
    return {
        "img_w": jax.random.normal(ks[0], (F_IMG, D), jnp.float32) * 0.02,
        "img_b": jnp.zeros((D,), jnp.float32),
        "embed": jax.random.normal(ks[1], (VOCAB, D), jnp.float32) * 0.02,
        # PromptLearner
        "prompt_tokens": jax.random.normal(ks[2], (T, D), jnp.float32),
        # nn.MultiheadAttention(dim=D, num_heads=8) params (in_proj split q/k/v)
        "wq": jax.random.normal(ks[3], (D, D), jnp.float32) * sd,
        "wk": jax.random.normal(ks[4], (D, D), jnp.float32) * sd,
        "wv": jax.random.normal(ks[5], (D, D), jnp.float32) * sd,
        "wo": jax.random.normal(ks[6], (D, D), jnp.float32) * sd,
        "bq": jnp.zeros((D,), jnp.float32),
        "bk": jnp.zeros((D,), jnp.float32),
        "bv": jnp.zeros((D,), jnp.float32),
        "bo": jnp.zeros((D,), jnp.float32),
    }


if __name__ == "__main__":
    key = jax.random.PRNGKey(0)
    pkey, ikey, ckey, lkey = jax.random.split(key, 4)
    params = init_params(pkey)
    kparams = prepare_kernel_params(params)      # once, outside jit

    images = jax.random.normal(ikey, (B, C, IH, IW), jnp.float32)        # NCHW
    captions = jax.random.randint(ckey, (B, S), 0, VOCAB)
    lengths = jnp.array([8, 6, 7, 5], jnp.int32)
    long_captions = jax.random.randint(lkey, (B, S), 0, VOCAB)
    long_lengths = jnp.array([8, 8, 8, 8], jnp.int32)

    loss, sims = vse_forward(kparams, images, captions, lengths,
                             long_captions, long_lengths)
    jax.block_until_ready((loss, sims))
    assert sims.shape == (B, B)
    assert loss.shape == ()
    print("KERNEL_OK")
</pallas_src>

<mosaic_0001>
module attributes {stable_mosaic.version = 11 : i64} {
  func.func @_vse_fused_kernel(%arg0: memref<32x128xf32, #tpu.memory_space<vmem>>, %arg1: memref<32x128xf32, #tpu.memory_space<vmem>>, %arg2: memref<4x1xi32, #tpu.memory_space<vmem>>, %arg3: memref<4x1xi32, #tpu.memory_space<vmem>>, %arg4: memref<4x192xf32, #tpu.memory_space<vmem>>, %arg5: memref<192x128xf32, #tpu.memory_space<vmem>>, %arg6: memref<1x128xf32, #tpu.memory_space<vmem>>, %arg7: memref<128x128xf32, #tpu.memory_space<vmem>>, %arg8: memref<128x256xf32, #tpu.memory_space<vmem>>, %arg9: memref<1x256xf32, #tpu.memory_space<vmem>>, %arg10: memref<128x128xf32, #tpu.memory_space<vmem>>, %arg11: memref<1x128xf32, #tpu.memory_space<vmem>>, %arg12: memref<128x128xf32, #tpu.memory_space<vmem>>, %arg13: memref<128x32xf32, #tpu.memory_space<vmem>>, %arg14: memref<4x128xf32, #tpu.memory_space<vmem>>, %arg15: memref<5x4xf32, #tpu.memory_space<vmem>>) attributes {dimension_semantics = [], scalar_prefetch = 0 : i64, scratch_operands = 0 : i64, tpu.core_type = #tpu.core_type<tc>} {
    %c0 = arith.constant 0 : index
    %c0_0 = arith.constant 0 : index
    %0 = vector.load %arg4[%c0, %c0_0] : memref<4x192xf32, #tpu.memory_space<vmem>>, vector<4x192xf32>
    %c0_1 = arith.constant 0 : index
    %c0_2 = arith.constant 0 : index
    %1 = vector.load %arg5[%c0_1, %c0_2] : memref<192x128xf32, #tpu.memory_space<vmem>>, vector<192x128xf32>
    %cst = arith.constant dense<0.000000e+00> : vector<4x128xf32>
    %2 = tpu.matmul %0, %1, %cst {dimension_numbers = #tpu.dot_dimension_numbers<[1], [0], [0], [1], [0, 0, 1, 1], [], []>} : vector<4x192xf32>, vector<192x128xf32>, vector<4x128xf32> -> vector<4x128xf32>
    %c0_3 = arith.constant 0 : index
    %c0_4 = arith.constant 0 : index
    %3 = vector.load %arg6[%c0_3, %c0_4] : memref<1x128xf32, #tpu.memory_space<vmem>>, vector<1x128xf32>
    %4 = vector.broadcast %3 : vector<1x128xf32> to vector<4x128xf32>
    %5 = arith.addf %2, %4 : vector<4x128xf32>
    %6 = tpu.iota {dimensions = array<i32: 1>} : vector<4x32xi32>
    %7 = tpu.iota {dimensions = array<i32: 0>} : vector<4x32xi32>
    %c8_i32 = arith.constant 8 : i32
    %8 = vector.broadcast %c8_i32 : i32 to vector<4x32xi32>
    %9 = arith.muli %7, %8 : vector<4x32xi32>
    %c0_5 = arith.constant 0 : index
    %c0_6 = arith.constant 0 : index
    %10 = vector.load %arg0[%c0_5, %c0_6] : memref<32x128xf32, #tpu.memory_space<vmem>>, vector<32x128xf32>
    %c0_7 = arith.constant 0 : index
    %c0_8 = arith.constant 0 : index
    %11 = vector.load %arg1[%c0_7, %c0_8] : memref<32x128xf32, #tpu.memory_space<vmem>>, vector<32x128xf32>
    %c0_9 = arith.constant 0 : index
    %c0_10 = arith.constant 0 : index
    %12 = vector.load %arg3[%c0_9, %c0_10] : memref<4x1xi32, #tpu.memory_space<vmem>>, vector<4x1xi32>
    %13 = arith.cmpi sge, %6, %9 : vector<4x32xi32>
    %14 = vector.broadcast %12 : vector<4x1xi32> to vector<4x32xi32>
    %15 = arith.addi %9, %14 : vector<4x32xi32>
    %16 = arith.cmpi slt, %6, %15 : vector<4x32xi32>
    %17 = arith.andi %13, %16 : vector<4x32xi1>
    %18 = arith.extui %17 : vector<4x32xi1> to vector<4x32xi32>
    %19 = arith.sitofp %18 : vector<4x32xi32> to vector<4x32xf32>
    %20 = arith.sitofp %12 : vector<4x1xi32> to vector<4x1xf32>
    %21 = vector.broadcast %20 : vector<4x1xf32> to vector<4x32xf32>
    %22 = arith.divf %19, %21 : vector<4x32xf32>
    %cst_11 = arith.constant dense<0.000000e+00> : vector<4x128xf32>
    %23 = tpu.matmul %22, %11, %cst_11 {dimension_numbers = #tpu.dot_dimension_numbers<[1], [0], [0], [1], [0, 0, 1, 1], [], []>} : vector<4x32xf32>, vector<32x128xf32>, vector<4x128xf32> -> vector<4x128xf32>
    %c0_12 = arith.constant 0 : index
    %c0_13 = arith.constant 0 : index
    %24 = vector.load %arg8[%c0_12, %c0_13] : memref<128x256xf32, #tpu.memory_space<vmem>>, vector<128x256xf32>
    %cst_14 = arith.constant dense<0.000000e+00> : vector<32x256xf32>
    %25 = tpu.matmul %10, %24, %cst_14 {dimension_numbers = #tpu.dot_dimension_numbers<[1], [0], [0], [1], [0, 0, 1, 1], [], []>} : vector<32x128xf32>, vector<128x256xf32>, vector<32x256xf32> -> vector<32x256xf32>
    %c0_15 = arith.constant 0 : index
    %c0_16 = arith.constant 0 : index
    %26 = vector.load %arg9[%c0_15, %c0_16] : memref<1x256xf32, #tpu.memory_space<vmem>>, vector<1x256xf32>
    %27 = vector.broadcast %26 : vector<1x256xf32> to vector<32x256xf32>
    %28 = arith.addf %25, %27 : vector<32x256xf32>
    %29 = vector.extract_strided_slice %28 {offsets = [0, 0], sizes = [32, 128], strides = [1, 1]} : vector<32x256xf32> to vector<32x128xf32>
    %30 = vector.extract_strided_slice %28 {offsets = [0, 128], sizes = [32, 128], strides = [1, 1]} : vector<32x256xf32> to vector<32x128xf32>
    %c0_17 = arith.constant 0 : index
    %c0_18 = arith.constant 0 : index
    %31 = vector.load %arg7[%c0_17, %c0_18] : memref<128x128xf32, #tpu.memory_space<vmem>>, vector<128x128xf32>
    %cst_19 = arith.constant dense<0.000000e+00> : vector<128x32xf32>
    %32 = tpu.matmul %31, %29, %cst_19 {dimension_numbers = #tpu.dot_dimension_numbers<[1], [1], [0], [0], [0, 0, 1, 0], [], []>} : vector<128x128xf32>, vector<32x128xf32>, vector<128x32xf32> -> vector<128x32xf32>
    %c0_20 = arith.constant 0 : index
    %c0_21 = arith.constant 0 : index
    %33 = vector.load %arg13[%c0_20, %c0_21] : memref<128x32xf32, #tpu.memory_space<vmem>>, vector<128x32xf32>
    %34 = arith.addf %32, %33 : vector<128x32xf32>
    %cst_22 = arith.constant dense<0xFF800000> : vector<128xf32>
    %35 = vector.multi_reduction <maximumf>, %34, %cst_22 [1] : vector<128x32xf32> to vector<128xf32>
    %36 = vector.shape_cast %35 : vector<128xf32> to vector<128x1xf32>
    %37 = vector.broadcast %36 : vector<128x1xf32> to vector<128x32xf32>
    %38 = arith.subf %34, %37 : vector<128x32xf32>
    %39 = math.exp %38 : vector<128x32xf32>
    %cst_23 = arith.constant dense<0.000000e+00> : vector<128xf32>
    %40 = vector.multi_reduction <add>, %39, %cst_23 [1] : vector<128x32xf32> to vector<128xf32>
    %41 = vector.shape_cast %40 : vector<128xf32> to vector<128x1xf32>
    %42 = tpu.reciprocal %41 : vector<128x1xf32> -> vector<128x1xf32>
    %43 = vector.broadcast %42 : vector<128x1xf32> to vector<128x32xf32>
    %44 = arith.mulf %39, %43 : vector<128x32xf32>
    %cst_24 = arith.constant dense<0.000000e+00> : vector<128x128xf32>
    %45 = tpu.matmul %44, %30, %cst_24 {dimension_numbers = #tpu.dot_dimension_numbers<[1], [0], [0], [1], [0, 0, 1, 1], [], []>} : vector<128x32xf32>, vector<32x128xf32>, vector<128x128xf32> -> vector<128x128xf32>
    %c0_25 = arith.constant 0 : index
    %c0_26 = arith.constant 0 : index
    %46 = vector.load %arg12[%c0_25, %c0_26] : memref<128x128xf32, #tpu.memory_space<vmem>>, vector<128x128xf32>
    %47 = arith.mulf %45, %46 : vector<128x128xf32>
    %c0_27 = arith.constant 0 : index
    %c0_28 = arith.constant 0 : index
    %48 = vector.load %arg14[%c0_27, %c0_28] : memref<4x128xf32, #tpu.memory_space<vmem>>, vector<4x128xf32>
    %cst_29 = arith.constant dense<0.000000e+00> : vector<4x128xf32>
    %49 = tpu.matmul %48, %47, %cst_29 {dimension_numbers = #tpu.dot_dimension_numbers<[1], [0], [0], [1], [0, 0, 1, 1], [], []>} : vector<4x128xf32>, vector<128x128xf32>, vector<4x128xf32> -> vector<4x128xf32>
    %c0_30 = arith.constant 0 : index
    %c0_31 = arith.constant 0 : index
    %50 = vector.load %arg10[%c0_30, %c0_31] : memref<128x128xf32, #tpu.memory_space<vmem>>, vector<128x128xf32>
    %cst_32 = arith.constant dense<0.000000e+00> : vector<4x128xf32>
    %51 = tpu.matmul %49, %50, %cst_32 {dimension_numbers = #tpu.dot_dimension_numbers<[1], [0], [0], [1], [0, 0, 1, 1], [], []>} : vector<4x128xf32>, vector<128x128xf32>, vector<4x128xf32> -> vector<4x128xf32>
    %c0_33 = arith.constant 0 : index
    %c0_34 = arith.constant 0 : index
    %52 = vector.load %arg11[%c0_33, %c0_34] : memref<1x128xf32, #tpu.memory_space<vmem>>, vector<1x128xf32>
    %53 = vector.broadcast %52 : vector<1x128xf32> to vector<4x128xf32>
    %54 = arith.addf %51, %53 : vector<4x128xf32>
    %55 = arith.mulf %5, %5 : vector<4x128xf32>
    %cst_35 = arith.constant dense<0.000000e+00> : vector<4xf32>
    %56 = vector.multi_reduction <add>, %55, %cst_35 [1] : vector<4x128xf32> to vector<4xf32>
    %57 = vector.shape_cast %56 : vector<4xf32> to vector<4x1xf32>
    %58 = arith.mulf %54, %54 : vector<4x128xf32>
    %cst_36 = arith.constant dense<0.000000e+00> : vector<4xf32>
    %59 = vector.multi_reduction <add>, %58, %cst_36 [1] : vector<4x128xf32> to vector<4xf32>
    %60 = vector.shape_cast %59 : vector<4xf32> to vector<4x1xf32>
    %61 = math.sqrt %57 : vector<4x1xf32>
    %cst_37 = arith.constant 9.99999993E-9 : f32
    %62 = vector.broadcast %cst_37 : f32 to vector<4x1xf32>
    %63 = arith.addf %61, %62 : vector<4x1xf32>
    %64 = vector.broadcast %63 : vector<4x1xf32> to vector<4x128xf32>
    %65 = arith.divf %5, %64 : vector<4x128xf32>
    %66 = math.sqrt %60 : vector<4x1xf32>
    %cst_38 = arith.constant 9.99999993E-9 : f32
    %67 = vector.broadcast %cst_38 : f32 to vector<4x1xf32>
    %68 = arith.addf %66, %67 : vector<4x1xf32>
    %69 = vector.broadcast %68 : vector<4x1xf32> to vector<4x128xf32>
    %70 = arith.divf %54, %69 : vector<4x128xf32>
    %cst_39 = arith.constant dense<0.000000e+00> : vector<4x4xf32>
    %71 = tpu.matmul %65, %70, %cst_39 {dimension_numbers = #tpu.dot_dimension_numbers<[1], [1], [0], [0], [0, 0, 1, 0], [], []>} : vector<4x128xf32>, vector<4x128xf32>, vector<4x4xf32> -> vector<4x4xf32>
    %72 = arith.mulf %23, %23 : vector<4x128xf32>
    %cst_40 = arith.constant dense<0.000000e+00> : vector<4xf32>
    %73 = vector.multi_reduction <add>, %72, %cst_40 [1] : vector<4x128xf32> to vector<4xf32>
    %74 = vector.shape_cast %73 : vector<4xf32> to vector<4x1xf32>
    %75 = math.rsqrt %60 : vector<4x1xf32>
    %76 = vector.broadcast %75 : vector<4x1xf32> to vector<4x128xf32>
    %77 = arith.mulf %54, %76 : vector<4x128xf32>
    %78 = math.rsqrt %74 : vector<4x1xf32>
    %79 = vector.broadcast %78 : vector<4x1xf32> to vector<4x128xf32>
    %80 = arith.mulf %23, %79 : vector<4x128xf32>
    %81 = arith.mulf %77, %80 : vector<4x128xf32>
    %cst_41 = arith.constant dense<0.000000e+00> : vector<4xf32>
    %82 = vector.multi_reduction <add>, %81, %cst_41 [1] : vector<4x128xf32> to vector<4xf32>
    %83 = vector.shape_cast %82 : vector<4xf32> to vector<4x1xf32>
    %84 = vector.shape_cast %83 : vector<4x1xf32> to vector<1x4x1xf32>
    %cst_42 = arith.constant dense<0.000000e+00> : vector<1xf32>
    %85 = vector.multi_reduction <add>, %84, %cst_42 [1, 2] : vector<1x4x1xf32> to vector<1xf32>
    %86 = vector.shape_cast %85 : vector<1xf32> to vector<1x1x1xf32>
    %87 = vector.extract %86[0, 0, 0] : f32 from vector<1x1x1xf32>
    %88 = vector.broadcast %87 : f32 to vector<1x1xf32>
    %cst_43 = arith.constant 2.500000e-01 : f32
    %89 = vector.broadcast %cst_43 : f32 to vector<1x1xf32>
    %90 = arith.mulf %88, %89 : vector<1x1xf32>
    %cst_44 = arith.constant 1.000000e+00 : f32
    %91 = vector.broadcast %cst_44 : f32 to vector<1x1xf32>
    %92 = arith.subf %91, %90 : vector<1x1xf32>
    %c0_45 = arith.constant 0 : index
    %c0_46 = arith.constant 0 : index
    %93 = vector.load %arg15[%c0_45, %c0_46] : memref<5x4xf32, #tpu.memory_space<vmem>>, vector<4x4xf32>
    tpu.vector_store %arg15[%c0_45, %c0_46], %71 {strides = array<i32>} : memref<5x4xf32, #tpu.memory_space<vmem>>, vector<4x4xf32>,
    %94 = vector.shape_cast %92 : vector<1x1xf32> to vector<1x1xf32>
    %95 = vector.broadcast %94 : vector<1x1xf32> to vector<1x4xf32>
    %c4 = arith.constant 4 : index
    %c0_47 = arith.constant 0 : index
    %96 = vector.load %arg15[%c4, %c0_47] : memref<5x4xf32, #tpu.memory_space<vmem>>, vector<1x4xf32>
    tpu.vector_store %arg15[%c4, %c0_47], %95 {strides = array<i32>} : memref<5x4xf32, #tpu.memory_space<vmem>>, vector<1x4xf32>,
    return
  }
}

</mosaic_0001>

<bundles_post_ra>
// kernel: vse_forward.1
= control target key start
LH: loop header
LB: loop body
LE: loop exit
PB: predicated region body
PF: predicated region fallthrough
CT: control target
= control target key end

     0   :  { %v1744_v0 = vmov 0   ;;  %v1745_v6 = vmov 0.0|0.0   ;;  %vm1746_vm0 = vmmov 0   ;;  %v1747_v13 = vmov 0.0   ;;  %s2476_s3 = inlined_call_operand.vmem [shape: s32[4,1], index: 3, kind: input, shape index: {}]   ;;  %s2477_s2 = inlined_call_operand.vmem [shape: s32[4,1], index: 2, kind: input, shape index: {}]   ;;  %s2478_s1 = inlined_call_operand.vmem [shape: f32[32,128], index: 1, kind: input, shape index: {}]   ;;  %s2479_s8 = inlined_call_operand.vmem [shape: f32[128,256], index: 8, kind: input, shape index: {}]   ;;  %s2480_s5 = inlined_call_operand.vmem [shape: f32[192,128], index: 5, kind: input, shape index: {}]   ;;  %s2481_s0 = inlined_call_operand.vmem [shape: f32[32,128], index: 0, kind: input, shape index: {}]   ;;  %s2482_s4 = inlined_call_operand.vmem [shape: f32[4,192], index: 4, kind: input, shape index: {}]   ;;  %s2483_s7 = inlined_call_operand.vmem [shape: f32[128,128], index: 7, kind: input, shape index: {}]   ;;  %s2484_s9 = inlined_call_operand.vmem [shape: f32[1,256], index: 9, kind: input, shape index: {}]   ;;  %s2485_s13 = inlined_call_operand.vmem [shape: f32[128,32], index: 13, kind: input, shape index: {}]   ;;  %s2486_s6 = inlined_call_operand.vmem [shape: f32[1,128], index: 6, kind: input, shape index: {}]   ;;  %s2487_s10 = inlined_call_operand.vmem [shape: f32[128,128], index: 10, kind: input, shape index: {}]   ;;  %s2488_s12 = inlined_call_operand.vmem [shape: f32[128,128], index: 12, kind: input, shape index: {}]   ;;  %s2489_s14 = inlined_call_operand.vmem [shape: f32[4,128], index: 14, kind: input, shape index: {}]   ;;  %s2490_s11 = inlined_call_operand.vmem [shape: f32[1,128], index: 11, kind: input, shape index: {}]   ;;  %s2491_s15 = inlined_call_operand.vmem [shape: f32[5,4], index: 15, kind: output, shape index: {}]  }
   0x1   :  { %1666 = vset.pattern.permute.xlu0 %v1744_v0  ;;  %v170_v1 = vld [vmem:[%s2476_s3] sm:$0xf]  ;;  %v167_v4 = vld [vmem:[%s2478_s1 + $0x8] sm:$0xff]  ;;  %1558 = vmatprep.subr.bf16.mxu1 %v1745_v6  ;;  %v168_v7 = vld [vmem:[%s2478_s1 + $0x10] sm:$0xff]  ;;  %v157_v20 = vlaneseq  ;;  %vm188_vm4 = vcmask 261120   ;;  %vm84_vm5 = vcmask 523264  }
   0x2   :  { %v180_v2 = vcvt.s32.f32 %v170_v1  ;;  %v166_v3 = vld [vmem:[%s2478_s1] sm:$0xff]  ;;  %1522 = vmatprep.subr.bf16.mxu0 %v1745_v6  ;;  %v169_v8 = vld [vmem:[%s2478_s1 + $0x18] sm:$0xff]  ;;  %v263_v10 = vld [vmem:[%s2479_s8 + $0x8] sm:$0xff]  ;;  %1380 = vmatprep.mubr.msk.f32.mxu1 %vm1746_vm0, %v1747_v13  ;;  %vm1138_vm6 = vcmask 1043456   ;;  %vm1248_vm11 = vcmask 3072   ;;  %vm1262_vm12 = vcmask 27648  }
   0x3   :  { %v1559_v5 = vpack.c.bf16 %v167_v4, %v166_v3  ;;  %v1562_v9 = vpack.c.bf16 %v169_v8, %v168_v7  ;;  %v265_v11 = vld [vmem:[%s2479_s8 + $0x18] sm:$0xff]  ;;  %v51_v14 = vld [vmem:[%s2480_s5] sm:$0xff]  ;;  %v52_v15 = vld [vmem:[%s2480_s5 + $0x8] sm:$0xff]  ;;  %v1868_v21 = vshrl.u32 %v157_v20, 7  ;;  %v158_v23 = vand.u32 127, %v157_v20 }
   0x4   :  { %183 = vperm.xlu0 %1666, %v180_v2   ;;  %v1564_v12 = vpack.c.bf16 %v265_v11, %v263_v10  ;;  %v53_v16 = vld [vmem:[%s2480_s5 + $0x10] sm:$0xff]  ;;  %v1523_v17 = vpack.c.bf16 %v52_v15, %v51_v14  ;;  %v54_v18 = vld [vmem:[%s2480_s5 + $0x18] sm:$0xff]  ;;  %v262_v27 = vld [vmem:[%s2479_s8] sm:$0xff]  ;;  %vm1264_vm13 = vcmask 24576  }
   0x5   :  { %1560 = vmatpush3.bf16.msra.mxu1 %v1559_v5  ;;  %v1526_v19 = vpack.c.bf16 %v54_v18, %v53_v16  ;;  %v161_v24 = vmul.u32 8, %v1868_v21  ;;  %v264_v28 = vld [vmem:[%s2479_s8 + $0x10] sm:$0xff]  ;;  %v267_v29 = vld [vmem:[%s2479_s8 + $0x28] sm:$0xff]  ;;  %v269_v30 = vld [vmem:[%s2479_s8 + $0x38] sm:$0xff] }
   0x6   :  { %1561 = vmatprep.subr.bf16.mxu1 %v1745_v6  ;;  %1524 = vmatpush1.bf16.msra.mxu0 %v1523_v17  ;;  %v1566_v33 = vpack.c.bf16 %v264_v28, %v262_v27  ;;  %v1568_v35 = vpack.c.bf16 %v269_v30, %v267_v29  ;;  %v266_v36 = vld [vmem:[%s2479_s8 + $0x20] sm:$0xff]  ;;  %v268_v37 = vld [vmem:[%s2479_s8 + $0x30] sm:$0xff]  ;;  %v271_v38 = vld [vmem:[%s2479_s8 + $0x48] sm:$0xff] }
   0x7   :  { %1525 = vmatprep.subr.bf16.mxu0 %v1745_v6  ;;  %vm171_vm1 = vcmp.ge.s32.totalorder %v158_v23, %v161_v24  ;;  %v273_v39 = vld [vmem:[%s2479_s8 + $0x58] sm:$0xff]  ;;  %v1570_v40 = vpack.c.bf16 %v268_v37, %v266_v36  ;;  %v270_v42 = vld [vmem:[%s2479_s8 + $0x40] sm:$0xff]  ;;  %v272_v43 = vld [vmem:[%s2479_s8 + $0x50] sm:$0xff] }
   0x8   :  { %173 = vperm.xlu0 %1666, %v170_v1   ;;  %v1572_v41 = vpack.c.bf16 %v273_v39, %v271_v38  ;;  %v275_v44 = vld [vmem:[%s2479_s8 + $0x68] sm:$0xff]  ;;  %v277_v45 = vld [vmem:[%s2479_s8 + $0x78] sm:$0xff]  ;;  %v1574_v46 = vpack.c.bf16 %v272_v43, %v270_v42  ;;  %v274_v48 = vld [vmem:[%s2479_s8 + $0x60] sm:$0xff] }
   0x9   :  { %1563 = vmatpush3.bf16.msra.mxu1 %v1562_v9  ;;  %v1576_v47 = vpack.c.bf16 %v277_v45, %v275_v44  ;;  %v276_v49 = vld [vmem:[%s2479_s8 + $0x70] sm:$0xff]  ;;  %v279_v50 = vld [vmem:[%s2479_s8 + $0x88] sm:$0xff]  ;;  %v281_v51 = vld [vmem:[%s2479_s8 + $0x98] sm:$0xff] }
   0xa   :  { %1565 = vmatprep.subr.bf16.mxu1 %v1564_v12  ;;  %1527 = vmatpush1.bf16.msra.mxu0 %v1526_v19  ;;  %v1578_v52 = vpack.c.bf16 %v276_v49, %v274_v48  ;;  %v1580_v53 = vpack.c.bf16 %v281_v51, %v279_v50  ;;  %v278_v54 = vld [vmem:[%s2479_s8 + $0x80] sm:$0xff]  ;;  %v280_v55 = vld [vmem:[%s2479_s8 + $0x90] sm:$0xff]  ;;  %v283_v56 = vld [vmem:[%s2479_s8 + $0xa8] sm:$0xff] }
   0xb   :  { %1528 = vmatprep.subr.bf16.mxu0 %v1745_v6  ;;  %v285_v57 = vld [vmem:[%s2479_s8 + $0xb8] sm:$0xff]  ;;  %v1582_v58 = vpack.c.bf16 %v280_v55, %v278_v54  ;;  %v282_v60 = vld [vmem:[%s2479_s8 + $0xa0] sm:$0xff]  ;;  %v284_v61 = vld [vmem:[%s2479_s8 + $0xb0] sm:$0xff]  ;;  %v302_v55 = vsub.s32 1, %v1868_v21 }
   0xc   :  { %v1584_v59 = vpack.c.bf16 %v285_v57, %v283_v56  ;;  %v287_v62 = vld [vmem:[%s2479_s8 + $0xc8] sm:$0xff]  ;;  %v289_v63 = vld [vmem:[%s2479_s8 + $0xd8] sm:$0xff]  ;;  %v1586_v0 = vpack.c.bf16 %v284_v61, %v282_v60  ;;  %v286_v2 = vld [vmem:[%s2479_s8 + $0xc0] sm:$0xff] }
   0xd   :  { %v1588_v1 = vpack.c.bf16 %v289_v63, %v287_v62  ;;  %v288_v3 = vld [vmem:[%s2479_s8 + $0xd0] sm:$0xff]  ;;  %v291_v4 = vld [vmem:[%s2479_s8 + $0xe8] sm:$0xff]  ;;  %v293_v5 = vld [vmem:[%s2479_s8 + $0xf8] sm:$0xff] }
   0xe   :  { %v1590_v7 = vpack.c.bf16 %v288_v3, %v286_v2  ;;  %v1592_v8 = vpack.c.bf16 %v293_v5, %v291_v4  ;;  %v290_v9 = vld [vmem:[%s2479_s8 + $0xe0] sm:$0xff]  ;;  %v292_v10 = vld [vmem:[%s2479_s8 + $0xf0] sm:$0xff]  ;;  %v163_v14 = vld [vmem:[%s2481_s0 + $0x8] sm:$0xff] }
   0xf   :  { %v1594_v11 = vpack.c.bf16 %v292_v10, %v290_v9  ;;  %v162_v12 = vld [vmem:[%s2481_s0] sm:$0xff]  ;;  %v164_v15 = vld [vmem:[%s2481_s0 + $0x10] sm:$0xff]  ;;  %v165_v16 = vld [vmem:[%s2481_s0 + $0x18] sm:$0xff] }
  0x10   :  { %v55_v17 = vld [vmem:[%s2480_s5 + $0x20] sm:$0xff]  ;;  %v56_v18 = vld [vmem:[%s2480_s5 + $0x28] sm:$0xff]  ;;  %v57_v20 = vld [vmem:[%s2480_s5 + $0x30] sm:$0xff] }
  0x11   :  { %v1529_v19 = vpack.c.bf16 %v56_v18, %v55_v17  ;;  %v61_v27 = vld [vmem:[%s2480_s5 + $0x50] sm:$0xff]  ;;  %v62_v28 = vld [vmem:[%s2480_s5 + $0x58] sm:$0xff]  ;;  %v63_v30 = vld [vmem:[%s2480_s5 + $0x60] sm:$0xff] }
  0x12   :  { %v1538_v29 = vpack.c.bf16 %v62_v28, %v61_v27  ;;  %v67_v36 = vld [vmem:[%s2480_s5 + $0x80] sm:$0xff]  ;;  %v68_v37 = vld [vmem:[%s2480_s5 + $0x88] sm:$0xff]  ;;  %v69_v39 = vld [vmem:[%s2480_s5 + $0x90] sm:$0xff] }
  0x13   :  { %1530 = vmatpush1.bf16.msra.mxu0 %v1529_v19  ;;  %v1547_v38 = vpack.c.bf16 %v68_v37, %v67_v36  ;;  %v71_v42 = vld [vmem:[%s2480_s5 + $0xa0] sm:$0xff]  ;;  %v72_v43 = vld [vmem:[%s2480_s5 + $0xa8] sm:$0xff]  ;;  %v73_v45 = vld [vmem:[%s2480_s5 + $0xb0] sm:$0xff] }
  0x14   :  { %1531 = vmatprep.subr.bf16.mxu0 %v1745_v6  ;;  %v1553_v44 = vpack.c.bf16 %v72_v43, %v71_v42  ;;  %v50_v48 = vld [vmem:[%s2482_s4] sm:$0xff]  ;;  %v398_v17 = vld [vmem:[%s2483_s7 + $0x18] sm:$0xff]  ;;  %v400_v19 = vld [vmem:[%s2483_s7 + $0x28] sm:$0xff] }
  0x15   :  { %v83_v49 = vcombine.high %v50_v48, %v50_v48  ;;  %v395_v50 = vld [vmem:[%s2483_s7] sm:$0xff]  ;;  %v408_v28 = vld [vmem:[%s2483_s7 + $0x68] sm:$0xff]  ;;  %v414_v36 = vld [vmem:[%s2485_s13 + $0x18] sm:$0xff] }
  0x16   :  { %v294_v54 = vld [vmem:[%s2484_s9] sm:$0x3] }
  0x17   :  { %1271 = vmatprep.mubr.msk.f32.mxu0 %vm84_vm5, %v83_v49  ;;  %v399_v18 = vld [vmem:[%s2483_s7 + $0x20] sm:$0xff] }
  0x18   :  { %v407_v27 = vld [vmem:[%s2483_s7 + $0x60] sm:$0xff] }
  0x83   :  { %v184_v22 = vpop.permute.xlu0 %183 }
  0x84   :  { %1668 = vrcp.f32 %v184_v22  ;;  %v58_v22 = vld [vmem:[%s2480_s5 + $0x38] sm:$0xff] }
  0x87   :  { %v174_v25 = vpop.permute.xlu0 %173 }
  0x88   :  { %v175_v26 = vadd.s32 %v174_v25, %v161_v24  ;;  %v59_v24 = vld [vmem:[%s2480_s5 + $0x40] sm:$0xff]  ;;  %v60_v25 = vld [vmem:[%s2480_s5 + $0x48] sm:$0xff] }
  0x8a   :  { %vm176_vm2 = vcmp.lt.s32.totalorder %v158_v23, %v175_v26  ;;  %v1532_v23 = vpack.c.bf16 %v58_v22, %v57_v20  ;;  %v1535_v26 = vpack.c.bf16 %v60_v25, %v59_v24  ;;  %v401_v20 = vld [vmem:[%s2483_s7 + $0x30] sm:$0xff]  ;;  %v402_v22 = vld [vmem:[%s2483_s7 + $0x38] sm:$0xff]  ;;  %v404_v24 = vld [vmem:[%s2483_s7 + $0x48] sm:$0xff] }
  0x8b   :  { %vm177_vm3 = vmand %vm171_vm1, %vm176_vm2  ;;  %v405_v25 = vld [vmem:[%s2483_s7 + $0x50] sm:$0xff] }
  0x8c   :  { %v1272_v32 = vsel %vm177_vm3, 1.0, %v1747_v13  ;;  %1533 = vmatpush1.bf16.msra.mxu0 %v1532_v23  ;;  %v403_v23 = vld [vmem:[%s2483_s7 + $0x40] sm:$0xff] }
  0x8d   :  { %1534 = vmatprep.subr.bf16.mxu0 %v1745_v6 }
  0x8e   :  { %v1669_v31 = vpop.eup %1668 }
  0x8f   :  { %v187_v34 = vmul.f32 %v1669_v31, %v1272_v32  ;;  %v64_v31 = vld [vmem:[%s2480_s5 + $0x68] sm:$0xff] }
  0x90   :  { %1536 = vmatpush1.bf16.msra.mxu0 %v1535_v26  ;;  %v1541_v32 = vpack.c.bf16 %v64_v31, %v63_v30  ;;  %v406_v26 = vld [vmem:[%s2483_s7 + $0x58] sm:$0xff]  ;;  %v412_v31 = vld [vmem:[%s2485_s13 + $0x8] sm:$0xff] }
  0x91   :  { %1381 = vmatmul.mubr.msk.f32.vlgmr.msra.gmra.mrb[0].mxu1 %vm188_vm4, %v187_v34  ;;  %1537 = vmatprep.subr.bf16.mxu0 %v1745_v6  ;;  %v66_v34 = vld [vmem:[%s2480_s5 + $0x78] sm:$0xff] }
  0x92   :  { %1567 = vmatpush1.bf16.msra.mxu1 %v1566_v33  ;;  %370 = vmatprep.mubr.f32.mxu1 %v1747_v13  ;;  %v65_v33 = vld [vmem:[%s2480_s5 + $0x70] sm:$0xff]  ;;  %v410_v30 = vld [vmem:[%s2483_s7 + $0x78] sm:$0xff] }
  0x93   :  { %1569 = vmatprep.subr.bf16.mxu1 %v1568_v35  ;;  %v1544_v35 = vpack.c.bf16 %v66_v34, %v65_v33  ;;  %v411_v33 = vld [vmem:[%s2485_s13] sm:$0xff] }
  0x94   :  { %1539 = vmatpush1.bf16.msra.mxu0 %v1538_v29  ;;  %v409_v29 = vld [vmem:[%s2483_s7 + $0x70] sm:$0xff] }
  0x95   :  { %1540 = vmatprep.subr.bf16.mxu0 %v1745_v6 }
  0x96   :  { %1571 = vmatpush1.bf16.msra.mxu1 %v1570_v40  ;;  %v70_v40 = vld [vmem:[%s2480_s5 + $0x98] sm:$0xff] }
  0x97   :  { %1573 = vmatprep.subr.bf16.mxu1 %v1572_v41  ;;  %v1550_v41 = vpack.c.bf16 %v70_v40, %v69_v39  ;;  %v413_v39 = vld [vmem:[%s2485_s13 + $0x10] sm:$0xff] }
  0x98   :  { %1542 = vmatpush1.bf16.msra.mxu0 %v1541_v32 }
  0x99   :  { %1543 = vmatprep.subr.bf16.mxu0 %v1745_v6 }
  0x9a   :  { %1575 = vmatpush1.bf16.msra.mxu1 %v1574_v46  ;;  %v74_v46 = vld [vmem:[%s2480_s5 + $0xb8] sm:$0xff] }
  0x9b   :  { %1577 = vmatprep.subr.bf16.mxu1 %v1576_v47  ;;  %v1556_v47 = vpack.c.bf16 %v74_v46, %v73_v45 }
  0x9c   :  { %1545 = vmatpush1.bf16.msra.mxu0 %v1544_v35 }
  0x9d   :  { %1546 = vmatprep.subr.bf16.mxu0 %v1745_v6 }
  0x9e   :  { %1579 = vmatpush1.bf16.msra.mxu1 %v1578_v52 }
  0x9f   :  { %1581 = vmatprep.subr.bf16.mxu1 %v1580_v53  ;;  %v298_v53 = vsub.s32 0, %v1868_v21 }
  0xa0   :  { %1548 = vmatpush1.bf16.msra.mxu0 %v1547_v38 }
  0xa1   :  { %1549 = vmatprep.subr.bf16.mxu0 %v1745_v6  ;;  %v299_v57 = vrot.slane %v294_v54, %v298_v53 }
  0xa2   :  { %1583 = vmatpush1.bf16.msra.mxu1 %v1582_v58 }
  0xa3   :  { %1585 = vmatprep.subr.bf16.mxu1 %v1584_v59  ;;  %v303_v59 = vrot.slane %v294_v54, %v302_v55 }
  0xa4   :  { %1551 = vmatpush1.bf16.msra.mxu0 %v1550_v41 }
  0xa5   :  { %1552 = vmatprep.subr.bf16.mxu0 %v1745_v6 }
  0xa6   :  { %1587 = vmatpush1.bf16.msra.mxu1 %v1586_v0 }
  0xa7   :  { %1589 = vmatprep.subr.bf16.mxu1 %v1588_v1 }
  0xa8   :  { %1554 = vmatpush1.bf16.msra.mxu0 %v1553_v44  ;;  %v416_v44 = vld [vmem:[%s2485_s13 + $0x28] sm:$0xff] }
  0xa9   :  { %1555 = vmatprep.subr.bf16.mxu0 %v1745_v6 }
  0xaa   :  { %1591 = vmatpush1.bf16.msra.mxu1 %v1590_v7 }
  0xab   :  { %1593 = vmatprep.subr.bf16.mxu1 %v1592_v8 }
  0xac   :  { %1557 = vmatpush1.bf16.msra.mxu0 %v1556_v47 }
  0xae   :  { %1595 = vmatpush1.bf16.msra.mxu1 %v1594_v11 }
  0xaf   :  { %152 = vmatmul.mubr.f32.vlgmr.msra.gmra.mrb[0].mxu0 %v50_v48 }
  0xb1   :  { %371 = vmatmul.mubr.f32.vlgmr.msra.gmra.mrb[2].mxu1 %v162_v12 }
  0xb2   :  { %376 = vmatprep.mubr.f32.mxu1 %v1747_v13 }
  0xb5   :  { %377 = vmatmul.mubr.f32.gmra.mrb[4].mxu1 %v163_v14 }
  0xb6   :  { %382 = vmatprep.mubr.f32.mxu1 %v1747_v13 }
  0xb9   :  { %383 = vmatmul.mubr.f32.gmra.mrb[6].mxu1 %v164_v15  ;;  %v396_v15 = vld [vmem:[%s2483_s7 + $0x8] sm:$0xff] }
  0xba   :  { %388 = vmatprep.mubr.f32.mxu1 %v1747_v13 }
  0xbd   :  { %389 = vmatmul.mubr.f32.gmra.mrb[8].mxu1 %v165_v16  ;;  %v397_v16 = vld [vmem:[%s2483_s7 + $0x10] sm:$0xff] }
  0xbe   :  { %1391 = vmatprep.mubr.f32.mxu1 %v395_v50 }
 0x164   :  { %v2054_v51 = vpop.f32.mrb[0].mxu1 }
 0x165   :  { %v1382_v52 = vpop.f32.mrb[1].mxu1 }
 0x166   :  { %v415_v52 = vld [vmem:[%s2485_s13 + $0x20] sm:$0xff] }
 0x184   :  { %v372_v56 = vpop.f32.mrb[2].mxu1 }
 0x185   :  { %v374_v58 = vpop.f32.mrb[3].mxu1  ;;  %v373_v61 = vadd.f32 %v372_v56, %v299_v57  ;;  %v418_v56 = vld [vmem:[%s2485_s13 + $0x38] sm:$0xff] }
 0x186   :  { %v375_v0 = vadd.f32 %v374_v58, %v303_v59 }
 0x188   :  { %v378_v60 = vpop.f32.mrb[4].mxu1 }
 0x189   :  { %v379_v62 = vadd.f32 %v378_v60, %v299_v57  ;;  %v380_v63 = vpop.f32.mrb[5].mxu1 }
 0x18a   :  { %v381_v1 = vadd.f32 %v380_v63, %v303_v59  ;;  %v417_v63 = vld [vmem:[%s2485_s13 + $0x30] sm:$0xff] }
 0x18b   :  { %v1596_v2 = vpack.c.bf16 %v379_v62, %v373_v61  ;;  %v422_v61 = vld [vmem:[%s2485_s13 + $0x58] sm:$0xff] }
 0x18c   :  { %v1604_v3 = vpack.c.bf16 %v381_v1, %v375_v0  ;;  %v384_v4 = vpop.f32.mrb[6].mxu1 }
 0x18d   :  { %v386_v5 = vpop.f32.mrb[7].mxu1  ;;  %1597 = vmatprep.subr.bf16.mxu1 %v1596_v2  ;;  %v385_v21 = vadd.f32 %v384_v4, %v299_v57  ;;  %v420_v4 = vld [vmem:[%s2485_s13 + $0x48] sm:$0xff] }
 0x18e   :  { %1599 = vmatpush3.bf16.xpose.msra.mxu1 %v1596_v2  ;;  %1605 = vmatprep.subr.bf16.mxu0 %v1604_v3  ;;  %v387_v10 = vadd.f32 %v386_v5, %v303_v59  ;;  %v424_v5 = vld [vmem:[%s2485_s13 + $0x68] sm:$0xff] }
 0x18f   :  { %1607 = vmatpush3.bf16.msra.mxu0 %v1604_v3 }
 0x190   :  { %v390_v7 = vpop.f32.mrb[8].mxu1 }
 0x191   :  { %v391_v8 = vadd.f32 %v390_v7, %v299_v57  ;;  %v392_v9 = vpop.f32.mrb[9].mxu1 }
 0x192   :  { %v393_v11 = vadd.f32 %v392_v9, %v303_v59 }
 0x193   :  { %v1600_v12 = vpack.c.bf16 %v391_v8, %v385_v21 }
 0x194   :  { %v1608_v14 = vpack.c.bf16 %v393_v11, %v387_v10 }
 0x195   :  { %1601 = vmatprep.subr.bf16.mxu1 %v1600_v12 }
 0x196   :  { %1603 = vmatpush3.bf16.xpose.msra.mxu1 %v1600_v12  ;;  %1609 = vmatprep.subr.bf16.mxu0 %v1608_v14  ;;  %v426_v12 = vld [vmem:[%s2485_s13 + $0x78] sm:$0xff] }
 0x197   :  { %1611 = vmatpush3.bf16.msra.mxu0 %v1608_v14  ;;  %1636 = vmatprep.subr.bf16.mxu1 %v1745_v6 }
 0x198   :  { %1612 = vmatprep.subr.bf16.mxu0 %v1745_v6 }
 0x19d   :  { %1392 = vmatmul.mubr.f32.vlgmr.msra.gmra.mrb[10].mxu1 %v396_v15 }
 0x19e   :  { %1394 = vmatprep.mubr.f32.mxu1 %v397_v16  ;;  %v419_v16 = vld [vmem:[%s2485_s13 + $0x40] sm:$0xff] }
 0x1a1   :  { %1395 = vmatmul.mubr.f32.gmra.mrb[12].mxu1 %v398_v17 }
 0x1a2   :  { %1397 = vmatprep.mubr.f32.mxu1 %v399_v18 }
 0x1a5   :  { %1398 = vmatmul.mubr.f32.gmra.mrb[14].mxu1 %v400_v19 }
 0x1a6   :  { %1400 = vmatprep.mubr.f32.mxu1 %v401_v20 }
 0x1a9   :  { %1401 = vmatmul.mubr.f32.gmra.mrb[16].mxu1 %v402_v22  ;;  %v421_v22 = vld [vmem:[%s2485_s13 + $0x50] sm:$0xff] }
 0x1aa   :  { %1403 = vmatprep.mubr.f32.mxu1 %v403_v23 }
 0x1ad   :  { %1404 = vmatmul.mubr.f32.gmra.mrb[18].mxu1 %v404_v24 }
 0x1ae   :  { %1406 = vmatprep.mubr.f32.mxu1 %v405_v25 }
 0x1b1   :  { %1407 = vmatmul.mubr.f32.gmra.mrb[20].mxu1 %v406_v26  ;;  %v423_v26 = vld [vmem:[%s2485_s13 + $0x60] sm:$0xff] }
 0x1b2   :  { %1409 = vmatprep.mubr.f32.mxu1 %v407_v27 }
 0x1b5   :  { %1410 = vmatmul.mubr.f32.gmra.mrb[22].mxu1 %v408_v28 }
 0x1b6   :  { %1412 = vmatprep.mubr.f32.mxu1 %v409_v29 }
 0x1b9   :  { %1413 = vmatmul.mubr.f32.gmra.mrb[24].mxu1 %v410_v30  ;;  %v425_v30 = vld [vmem:[%s2485_s13 + $0x70] sm:$0xff] }
 0x1ba   :  { %1514 = vmatprep.mubr.msk.f32.mxu1 %vm1746_vm0, %v1747_v13 }
 0x270   :  { %v1393_v32 = vpop.f32.mrb[10].mxu1 }
 0x271   :  { %v2116_v34 = vadd.f32 %v1393_v32, %v412_v31  ;;  %v493_v35 = vpop.f32.mrb[11].mxu1 }
 0x272   :  { %v2121_v37 = vadd.f32 %v493_v35, %v411_v33 }
 0x273   :  { %v575_v38 = vsel %vm188_vm4, %v2116_v34, -inf }
 0x274   :  { %576 = vmax.xlane.f32.xlu1 %v575_v38  ;;  %v1396_v40 = vpop.f32.mrb[12].mxu1  ;;  %v572_v45 = vsel %vm188_vm4, %v2121_v37, -inf }
 0x275   :  { %v2128_v41 = vadd.f32 %v1396_v40, %v414_v36  ;;  %v503_v42 = vpop.f32.mrb[13].mxu1 }
 0x276   :  { %v2130_v43 = vadd.f32 %v503_v42, %v413_v39 }
 0x277   :  { %v581_v50 = vsel %vm188_vm4, %v2128_v41, -inf }
 0x278   :  { %573 = vmax.xlane.f32.xlu1 %v572_v45  ;;  %v578_v46 = vsel %vm188_vm4, %v2130_v43, -inf  ;;  %v1399_v47 = vpop.f32.mrb[14].mxu1 }
 0x279   :  { %579 = vmax.xlane.f32.xlu0 %v578_v46  ;;  %v2139_v48 = vadd.f32 %v1399_v47, %v416_v44  ;;  %v513_v49 = vpop.f32.mrb[15].mxu1 }
 0x27a   :  { %v2151_v57 = vadd.f32 %v513_v49, %v415_v52 }
 0x27b   :  { %v587_v54 = vsel %vm188_vm4, %v2139_v48, -inf }
 0x27c   :  { %582 = vmax.xlane.f32.xlu1 %v581_v50  ;;  %v1402_v53 = vpop.f32.mrb[16].mxu1  ;;  %v584_v62 = vsel %vm188_vm4, %v2151_v57, -inf }
 0x27d   :  { %v523_v55 = vpop.f32.mrb[17].mxu1  ;;  %v2153_v59 = vadd.f32 %v1402_v53, %v418_v56 }
 0x27e   :  { %v2173_v7 = vadd.f32 %v523_v55, %v417_v63 }
 0x27f   :  { %v593_v3 = vsel %vm188_vm4, %v2153_v59, -inf }
 0x280   :  { %588 = vmax.xlane.f32.xlu1 %v587_v54  ;;  %v1405_v58 = vpop.f32.mrb[18].mxu1  ;;  %v590_v15 = vsel %vm188_vm4, %v2173_v7, -inf }
 0x281   :  { %v533_v60 = vpop.f32.mrb[19].mxu1  ;;  %v2177_v9 = vadd.f32 %v1405_v58, %v420_v4 }
 0x282   :  { %v2198_v23 = vadd.f32 %v533_v60, %v419_v16 }
 0x283   :  { %v599_v19 = vsel %vm188_vm4, %v2177_v9, -inf }
 0x284   :  { %v1408_v0 = vpop.f32.mrb[20].mxu1  ;;  %585 = vmax.xlane.f32.xlu1 %v584_v62  ;;  %v596_v27 = vsel %vm188_vm4, %v2198_v23, -inf }
 0x285   :  { %v2163_v1 = vadd.f32 %v1408_v0, %v422_v61  ;;  %v543_v2 = vpop.f32.mrb[21].mxu1 }
 0x286   :  { %v2202_v25 = vadd.f32 %v543_v2, %v421_v22 }
 0x287   :  { %v605_v21 = vsel %vm188_vm4, %v2163_v1, -inf }
 0x288   :  { %v1411_v8 = vpop.f32.mrb[22].mxu1  ;;  %606 = vmax.xlane.f32.xlu0 %v605_v21  ;;  %594 = vmax.xlane.f32.xlu1 %v593_v3  ;;  %v602_v29 = vsel %vm188_vm4, %v2202_v25, -inf }
 0x289   :  { %v2179_v10 = vadd.f32 %v1411_v8, %v424_v5  ;;  %v553_v11 = vpop.f32.mrb[23].mxu1 }
 0x28a   :  { %v2209_v28 = vadd.f32 %v553_v11, %v423_v26 }
 0x28b   :  { %v611_v14 = vsel %vm188_vm4, %v2179_v10, -inf }
 0x28c   :  { %v1414_v17 = vpop.f32.mrb[24].mxu1  ;;  %612 = vmax.xlane.f32.xlu0 %v611_v14  ;;  %591 = vmax.xlane.f32.xlu1 %v590_v15  ;;  %v608_v32 = vsel %vm188_vm4, %v2209_v28, -inf }
 0x28d   :  { %v2191_v18 = vadd.f32 %v1414_v17, %v426_v12  ;;  %v563_v20 = vpop.f32.mrb[25].mxu1 }
 0x28e   :  { %v2216_v31 = vadd.f32 %v563_v20, %v425_v30 }
 0x28f   :  { %v617_v24 = vsel %vm188_vm4, %v2191_v18, -inf }
 0x290   :  { %618 = vmax.xlane.f32.xlu0 %v617_v24  ;;  %600 = vmax.xlane.f32.xlu1 %v599_v19  ;;  %v614_v33 = vsel %vm188_vm4, %v2216_v31, -inf }
 0x294   :  { %597 = vmax.xlane.f32.xlu1 %v596_v27 }
 0x298   :  { %603 = vmax.xlane.f32.xlu1 %v602_v29 }
 0x29c   :  { %609 = vmax.xlane.f32.xlu1 %v608_v32 }
 0x2a0   :  { %615 = vmax.xlane.f32.xlu1 %v614_v33 }
 0x301   :  { %v577_v35 = vpop.xlane.xlu1 %576 }
 0x302   :  { %v621_v36 = vsub.f32 %v2116_v34, %v577_v35 }
 0x304   :  { %v638_v38 = vmul.f32 1.442695, %v621_v36 }
 0x305   :  { %v574_v39 = vpop.xlane.xlu1 %573 }
 0x306   :  { %1670 = vpow2.f32 %v638_v38  ;;  %v620_v40 = vsub.f32 %v2121_v37, %v574_v39  ;;  %v580_v42 = vpop.xlane.xlu0 %579 }
 0x307   :  { %v622_v44 = vsub.f32 %v2130_v43, %v580_v42 }
 0x308   :  { %v636_v45 = vmul.f32 1.442695, %v620_v40 }
 0x309   :  { %v640_v46 = vmul.f32 1.442695, %v622_v44  ;;  %v583_v47 = vpop.xlane.xlu1 %582 }
 0x30a   :  { %1672 = vpow2.f32 %v636_v45  ;;  %v623_v49 = vsub.f32 %v2128_v41, %v583_v47 }
 0x30b   :  { %1674 = vpow2.f32 %v640_v46 }
 0x30c   :  { %v642_v50 = vmul.f32 1.442695, %v623_v49 }
 0x30d   :  { %v589_v52 = vpop.xlane.xlu1 %588 }
 0x30e   :  { %1676 = vpow2.f32 %v642_v50  ;;  %v625_v34 = vsub.f32 %v2139_v48, %v589_v52 }
 0x310   :  { %v2227_v53 = vpop.eup %1670  ;;  %v646_v54 = vmul.f32 1.442695, %v625_v34 }
 0x311   :  { %v586_v55 = vpop.xlane.xlu1 %585  ;;  %v671_v37 = vsel %vm188_vm4, %v2227_v53, 0.0 }
 0x312   :  { %1678 = vpow2.f32 %v646_v54  ;;  %v624_v43 = vsub.f32 %v2151_v57, %v586_v55  ;;  %672 = vadd.xlane.f32.xlu0 %v671_v37 }
 0x314   :  { %v2232_v56 = vpop.eup %1672  ;;  %v644_v41 = vmul.f32 1.442695, %v624_v43 }
 0x315   :  { %v595_v58 = vpop.xlane.xlu1 %594  ;;  %v668_v60 = vsel %vm188_vm4, %v2232_v56, 0.0  ;;  %v2236_v61 = vpop.eup %1674 }
 0x316   :  { %1680 = vpow2.f32 %v644_v41  ;;  %v607_v48 = vpop.xlane.xlu0 %606  ;;  %v627_v62 = vsub.f32 %v2153_v59, %v595_v58  ;;  %669 = vadd.xlane.f32.xlu1 %v668_v60  ;;  %v674_v57 = vsel %vm188_vm4, %v2236_v61, 0.0  ;;  %v153_v58 = vpop.f32.mrb[0].mxu0  ;;  %v1270_v60 = vld [vmem:[%s2486_s6] ss:$0 sm:$0xff] }
 0x317   :  { %v631_v8 = vsub.f32 %v2163_v1, %v607_v48  ;;  %v155_v48 = vpop.f32.mrb[1].mxu0 }
 0x318   :  { %v2239_v63 = vpop.eup %1676  ;;  %v650_v0 = vmul.f32 1.442695, %v627_v62  ;;  %v2305_v62 = vadd.f32 %v1270_v60, %v153_v58  ;;  %v1049_v58 = vld [vmem:[%s2487_s10 + $0x28] sm:$0xff]  ;;  %v1050_v48 = vld [vmem:[%s2487_s10 + $0x30] sm:$0xff] }
 0x319   :  { %v592_v2 = vpop.xlane.xlu1 %591  ;;  %v677_v3 = vsel %vm188_vm4, %v2239_v63, 0.0  ;;  %v658_v16 = vmul.f32 1.442695, %v631_v8 }
 0x31a   :  { %v626_v4 = vsub.f32 %v2173_v7, %v592_v2  ;;  %675 = vadd.xlane.f32.xlu1 %v674_v57  ;;  %678 = vadd.xlane.f32.xlu0 %v677_v3  ;;  %1682 = vpow2.f32 %v650_v0  ;;  %v613_v21 = vpop.xlane.xlu0 %612  ;;  %v1137_v0 = vmul.f32 %v2305_v62, %v2305_v62 }
 0x31b   :  { %v633_v17 = vsub.f32 %v2179_v10, %v613_v21 }
 0x31c   :  { %v2246_v5 = vpop.eup %1678  ;;  %v648_v59 = vmul.f32 1.442695, %v626_v4  ;;  %v1139_v2 = vsel %vm1138_vm6, %v1137_v0, 0.0  ;;  %v1051_v0 = vld [vmem:[%s2487_s10 + $0x38] sm:$0xff] }
 0x31d   :  { %v601_v11 = vpop.xlane.xlu1 %600  ;;  %v683_v12 = vsel %vm188_vm4, %v2246_v5, 0.0 }
 0x31e   :  { %v629_v14 = vsub.f32 %v2177_v9, %v601_v11  ;;  %684 = vadd.xlane.f32.xlu0 %v683_v12  ;;  %1684 = vpow2.f32 %v648_v59  ;;  %v619_v22 = vpop.xlane.xlu0 %618  ;;  %v662_v9 = vmul.f32 1.442695, %v633_v17 }
 0x31f   :  { %v635_v27 = vsub.f32 %v2191_v18, %v619_v22 }
 0x320   :  { %v2252_v15 = vpop.eup %1680  ;;  %v654_v7 = vmul.f32 1.442695, %v629_v14 }
 0x321   :  { %v598_v19 = vpop.xlane.xlu1 %597  ;;  %v680_v20 = vsel %vm188_vm4, %v2252_v15, 0.0 }
 0x322   :  { %v628_v1 = vsub.f32 %v2198_v23, %v598_v19  ;;  %681 = vadd.xlane.f32.xlu1 %v680_v20  ;;  %1686 = vpow2.f32 %v654_v7  ;;  %v666_v23 = vmul.f32 1.442695, %v635_v27 }
 0x323   :  { %1688 = vpow2.f32 %v658_v16 }
 0x324   :  { %v652_v24 = vmul.f32 1.442695, %v628_v1  ;;  %v2258_v26 = vpop.eup %1682 }
 0x325   :  { %v604_v29 = vpop.xlane.xlu1 %603  ;;  %v689_v30 = vsel %vm188_vm4, %v2258_v26, 0.0 }
 0x326   :  { %1690 = vpow2.f32 %v652_v24  ;;  %v630_v10 = vsub.f32 %v2202_v25, %v604_v29  ;;  %690 = vadd.xlane.f32.xlu0 %v689_v30 }
 0x327   :  { %1692 = vpow2.f32 %v662_v9 }
 0x328   :  { %v656_v32 = vmul.f32 1.442695, %v630_v10  ;;  %v2264_v33 = vpop.eup %1684 }
 0x329   :  { %v610_v35 = vpop.xlane.xlu1 %609  ;;  %v686_v18 = vsel %vm188_vm4, %v2264_v33, 0.0 }
 0x32a   :  { %1694 = vpow2.f32 %v656_v32  ;;  %v632_v36 = vsub.f32 %v2209_v28, %v610_v35  ;;  %687 = vadd.xlane.f32.xlu1 %v686_v18 }
 0x32b   :  { %1696 = vpow2.f32 %v666_v23 }
 0x32c   :  { %v660_v38 = vmul.f32 1.442695, %v632_v36  ;;  %v2269_v39 = vpop.eup %1686 }
 0x32d   :  { %v616_v25 = vpop.xlane.xlu1 %615  ;;  %v695_v42 = vsel %vm188_vm4, %v2269_v39, 0.0  ;;  %v2274_v44 = vpop.eup %1688 }
 0x32e   :  { %1698 = vpow2.f32 %v660_v38  ;;  %v634_v40 = vsub.f32 %v2216_v31, %v616_v25  ;;  %696 = vadd.xlane.f32.xlu0 %v695_v42  ;;  %v701_v47 = vsel %vm188_vm4, %v2274_v44, 0.0 }
 0x330   :  { %v2276_v45 = vpop.eup %1690  ;;  %v664_v28 = vmul.f32 1.442695, %v634_v40 }
 0x331   :  { %v692_v46 = vsel %vm188_vm4, %v2276_v45, 0.0  ;;  %v2282_v49 = vpop.eup %1692 }
 0x332   :  { %1700 = vpow2.f32 %v664_v28  ;;  %693 = vadd.xlane.f32.xlu1 %v692_v46  ;;  %702 = vadd.xlane.f32.xlu0 %v701_v47  ;;  %v707_v52 = vsel %vm188_vm4, %v2282_v49, 0.0 }
 0x334   :  { %v2284_v31 = vpop.eup %1694 }
 0x335   :  { %v698_v50 = vsel %vm188_vm4, %v2284_v31, 0.0  ;;  %v2290_v34 = vpop.eup %1696 }
 0x336   :  { %699 = vadd.xlane.f32.xlu1 %v698_v50  ;;  %708 = vadd.xlane.f32.xlu0 %v707_v52  ;;  %v713_v37 = vsel %vm188_vm4, %v2290_v34, 0.0 }
 0x338   :  { %v2292_v54 = vpop.eup %1698 }
 0x339   :  { %v704_v55 = vsel %vm188_vm4, %v2292_v54, 0.0 }
 0x33a   :  { %705 = vadd.xlane.f32.xlu1 %v704_v55  ;;  %714 = vadd.xlane.f32.xlu0 %v713_v37  ;;  %v1046_v55 = vld [vmem:[%s2487_s10 + $0x10] sm:$0xff]  ;;  %v1047_v37 = vld [vmem:[%s2487_s10 + $0x18] sm:$0xff] }
 0x33c   :  { %v2298_v43 = vpop.eup %1700 }
 0x33d   :  { %v710_v41 = vsel %vm188_vm4, %v2298_v43, 0.0 }
 0x33e   :  { %711 = vadd.xlane.f32.xlu1 %v710_v41  ;;  %1140 = vadd.xlane.f32.xlu0 %v1139_v2  ;;  %v1048_v41 = vld [vmem:[%s2487_s10 + $0x20] sm:$0xff]  ;;  %v1646_v2 = vpack.c.bf16 %v1051_v0, %v1050_v48 }
 0x33f   :  { %v1643_v60 = vpack.c.bf16 %v1049_v58, %v1048_v41  ;;  %v953_v41 = vld [vmem:[%s2488_s12 + $0x60] sm:$0xff] }
 0x39f   :  { %v673_v57 = vpop.xlane.xlu0 %672 }
 0x3a0   :  { %1702 = vrcp.f32 %v673_v57  ;;  %v1052_v57 = vld [vmem:[%s2487_s10 + $0x40] sm:$0xff] }
 0x3a3   :  { %v670_v3 = vpop.xlane.xlu1 %669 }
 0x3a4   :  { %1704 = vrcp.f32 %v670_v3  ;;  %v1053_v3 = vld [vmem:[%s2487_s10 + $0x48] sm:$0xff] }
 0x3a7   :  { %v679_v4 = vpop.xlane.xlu0 %678  ;;  %v676_v21 = vpop.xlane.xlu1 %675 }
 0x3a8   :  { %1706 = vrcp.f32 %v679_v4  ;;  %v1649_v4 = vpack.c.bf16 %v1053_v3, %v1052_v57  ;;  %v956_v57 = vld [vmem:[%s2488_s12 + $0x78] sm:$0xff]  ;;  %v955_v3 = vld [vmem:[%s2488_s12 + $0x70] sm:$0xff] }
 0x3a9   :  { %1708 = vrcp.f32 %v676_v21  ;;  %v1054_v21 = vld [vmem:[%s2487_s10 + $0x50] sm:$0xff] }
 0x3aa   :  { %v1703_v8 = vpop.eup %1702 }
 0x3ab   :  { %v685_v59 = vpop.xlane.xlu0 %684  ;;  %v733_v7 = vmul.f32 %v1703_v8, %v2227_v53 }
 0x3ac   :  { %1710 = vrcp.f32 %v685_v59  ;;  %v1055_v59 = vld [vmem:[%s2487_s10 + $0x58] sm:$0xff] }
 0x3ad   :  { %v1652_v8 = vpack.c.bf16 %v1055_v59, %v1054_v21 }
 0x3ae   :  { %v1705_v11 = vpop.eup %1704 }
 0x3af   :  { %v682_v12 = vpop.xlane.xlu1 %681  ;;  %v732_v14 = vmul.f32 %v1705_v11, %v2232_v56  ;;  %v1056_v11 = vld [vmem:[%s2487_s10 + $0x60] sm:$0xff] }
 0x3b0   :  { %1712 = vrcp.f32 %v682_v12  ;;  %v1057_v12 = vld [vmem:[%s2487_s10 + $0x68] sm:$0xff] }
 0x3b1   :  { %1423 = vmatprep.mubr.msk.f32.mxu0 %vm188_vm4, %v732_v14  ;;  %v1655_v14 = vpack.c.bf16 %v1057_v12, %v1056_v11 }
 0x3b2   :  { %v1707_v16 = vpop.eup %1706  ;;  %1424 = vmatmul.mubr.msk.f32.vlgmr.msra.gmra.mrb[2].mxu0 %vm188_vm4, %v733_v7  ;;  %v1058_v7 = vld [vmem:[%s2487_s10 + $0x70] sm:$0xff] }
 0x3b3   :  { %v1709_v17 = vpop.eup %1708  ;;  %v735_v19 = vmul.f32 %v1707_v16, %v2239_v63  ;;  %v691_v22 = vpop.xlane.xlu0 %690  ;;  %v1059_v16 = vld [vmem:[%s2487_s10 + $0x78] sm:$0xff] }
 0x3b4   :  { %v734_v20 = vmul.f32 %v1709_v17, %v2236_v61  ;;  %1714 = vrcp.f32 %v691_v22  ;;  %v1658_v17 = vpack.c.bf16 %v1059_v16, %v1058_v7 }
 0x3b6   :  { %1426 = vmatprep.mubr.msk.f32.mxu0 %vm188_vm4, %v734_v20  ;;  %v1711_v1 = vpop.eup %1710  ;;  %v941_v20 = vld [vmem:[%s2488_s12] sm:$0xff] }
 0x3b7   :  { %1427 = vmatmul.mubr.msk.f32.gmra.mrb[4].mxu0 %vm188_vm4, %v735_v19  ;;  %v688_v56 = vpop.xlane.xlu1 %687  ;;  %v737_v27 = vmul.f32 %v1711_v1, %v2246_v5  ;;  %v942_v19 = vld [vmem:[%s2488_s12 + $0x8] sm:$0xff] }
 0x3b8   :  { %1716 = vrcp.f32 %v688_v56 }
 0x3ba   :  { %v1713_v53 = vpop.eup %1712 }
 0x3bb   :  { %v736_v24 = vmul.f32 %v1713_v53, %v2252_v15  ;;  %v697_v9 = vpop.xlane.xlu0 %696 }
 0x3bc   :  { %1718 = vrcp.f32 %v697_v9 }
 0x3bd   :  { %1429 = vmatprep.mubr.msk.f32.mxu0 %vm188_vm4, %v736_v24  ;;  %v944_v24 = vld [vmem:[%s2488_s12 + $0x18] sm:$0xff] }
 0x3be   :  { %1430 = vmatmul.mubr.msk.f32.gmra.mrb[6].mxu0 %vm188_vm4, %v737_v27  ;;  %v1715_v29 = vpop.eup %1714  ;;  %v943_v27 = vld [vmem:[%s2488_s12 + $0x10] sm:$0xff] }
 0x3bf   :  { %v694_v61 = vpop.xlane.xlu1 %693  ;;  %v703_v63 = vpop.xlane.xlu0 %702  ;;  %v739_v15 = vmul.f32 %v1715_v29, %v2258_v26 }
 0x3c0   :  { %1720 = vrcp.f32 %v694_v61 }
 0x3c1   :  { %1722 = vrcp.f32 %v703_v63 }
 0x3c2   :  { %v1717_v10 = vpop.eup %1716 }
 0x3c3   :  { %v700_v30 = vpop.xlane.xlu1 %699  ;;  %v709_v32 = vpop.xlane.xlu0 %708  ;;  %v738_v23 = vmul.f32 %v1717_v10, %v2264_v33 }
 0x3c4   :  { %1724 = vrcp.f32 %v700_v30 }
 0x3c5   :  { %1432 = vmatprep.mubr.msk.f32.mxu0 %vm188_vm4, %v738_v23  ;;  %1726 = vrcp.f32 %v709_v32  ;;  %v946_v32 = vld [vmem:[%s2488_s12 + $0x28] sm:$0xff]  ;;  %v945_v23 = vld [vmem:[%s2488_s12 + $0x20] sm:$0xff] }
 0x3c6   :  { %1433 = vmatmul.mubr.msk.f32.gmra.mrb[8].mxu0 %vm188_vm4, %v739_v15  ;;  %v1719_v36 = vpop.eup %1718 }
 0x3c7   :  { %v706_v5 = vpop.xlane.xlu1 %705  ;;  %v715_v35 = vpop.xlane.xlu0 %714  ;;  %v741_v40 = vmul.f32 %v1719_v36, %v2269_v39 }
 0x3c8   :  { %1728 = vrcp.f32 %v706_v5 }
 0x3c9   :  { %1730 = vrcp.f32 %v715_v35 }
 0x3ca   :  { %v1721_v18 = vpop.eup %1720 }
 0x3cb   :  { %v712_v38 = vpop.xlane.xlu1 %711  ;;  %v740_v25 = vmul.f32 %v1721_v18, %v2276_v45  ;;  %v1723_v33 = vpop.eup %1722 }
 0x3cc   :  { %1732 = vrcp.f32 %v712_v38  ;;  %v743_v28 = vmul.f32 %v1723_v33, %v2274_v44  ;;  %v948_v38 = vld [vmem:[%s2488_s12 + $0x38] sm:$0xff] }
 0x3cd   :  { %1435 = vmatprep.mubr.msk.f32.mxu0 %vm188_vm4, %v740_v25  ;;  %v947_v25 = vld [vmem:[%s2488_s12 + $0x30] sm:$0xff] }
 0x3ce   :  { %v1725_v26 = vpop.eup %1724  ;;  %1436 = vmatmul.mubr.msk.f32.gmra.mrb[10].mxu0 %vm188_vm4, %v741_v40 }
 0x3cf   :  { %v742_v42 = vmul.f32 %v1725_v26, %v2284_v31  ;;  %v1727_v46 = vpop.eup %1726 }
 0x3d0   :  { %v745_v39 = vmul.f32 %v1727_v46, %v2282_v49  ;;  %v1044_v49 = vld [vmem:[%s2487_s10] sm:$0xff]  ;;  %v950_v46 = vld [vmem:[%s2488_s12 + $0x48] sm:$0xff] }
 0x3d1   :  { %1438 = vmatprep.mubr.msk.f32.mxu0 %vm188_vm4, %v742_v42 }
 0x3d2   :  { %v1729_v47 = vpop.eup %1728  ;;  %1439 = vmatmul.mubr.msk.f32.gmra.mrb[12].mxu0 %vm188_vm4, %v743_v28 }
 0x3d3   :  { %v744_v45 = vmul.f32 %v1729_v47, %v2292_v54  ;;  %v1731_v50 = vpop.eup %1730  ;;  %v1045_v54 = vld [vmem:[%s2487_s10 + $0x8] sm:$0xff]  ;;  %v949_v47 = vld [vmem:[%s2488_s12 + $0x40] sm:$0xff] }
 0x3d4   :  { %v747_v44 = vmul.f32 %v1731_v50, %v2290_v34  ;;  %v1637_v34 = vpack.c.bf16 %v1045_v54, %v1044_v49 }
 0x3d5   :  { %1441 = vmatprep.mubr.msk.f32.mxu0 %vm188_vm4, %v744_v45 }
 0x3d6   :  { %v1733_v52 = vpop.eup %1732  ;;  %1442 = vmatmul.mubr.msk.f32.gmra.mrb[14].mxu0 %vm188_vm4, %v745_v39  ;;  %1638 = vmatpush3.bf16.msra.mxu1 %v1637_v34 }
 0x3d7   :  { %v746_v31 = vmul.f32 %v1733_v52, %v2298_v43  ;;  %v1640_v43 = vpack.c.bf16 %v1047_v37, %v1046_v55  ;;  %1639 = vmatprep.subr.bf16.mxu1 %v1745_v6 }
 0x3d9   :  { %1444 = vmatprep.mubr.msk.f32.mxu0 %vm188_vm4, %v746_v31  ;;  %v952_v31 = vld [vmem:[%s2488_s12 + $0x58] sm:$0xff] }
 0x3da   :  { %1445 = vmatmul.mubr.msk.f32.gmra.mrb[16].mxu0 %vm188_vm4, %v747_v44  ;;  %1641 = vmatpush3.bf16.msra.mxu1 %v1640_v43  ;;  %v951_v44 = vld [vmem:[%s2488_s12 + $0x50] sm:$0xff]  ;;  %v954_v43 = vld [vmem:[%s2488_s12 + $0x68] sm:$0xff] }
 0x3db   :  { %1479 = vmatprep.mubr.msk.f32.mxu0 %vm1746_vm0, %v1747_v13  ;;  %1642 = vmatprep.subr.bf16.mxu1 %v1745_v6 }
 0x3de   :  { %1644 = vmatpush3.bf16.msra.mxu1 %v1643_v60 }
 0x3df   :  { %1645 = vmatprep.subr.bf16.mxu1 %v1745_v6 }
 0x3e2   :  { %1647 = vmatpush3.bf16.msra.mxu1 %v1646_v2 }
 0x3e3   :  { %1648 = vmatprep.subr.bf16.mxu1 %v1745_v6 }
 0x3e6   :  { %1650 = vmatpush3.bf16.msra.mxu1 %v1649_v4 }
 0x3e7   :  { %1651 = vmatprep.subr.bf16.mxu1 %v1745_v6 }
 0x3ea   :  { %1653 = vmatpush3.bf16.msra.mxu1 %v1652_v8 }
 0x3eb   :  { %1654 = vmatprep.subr.bf16.mxu1 %v1745_v6 }
 0x3ee   :  { %1656 = vmatpush3.bf16.msra.mxu1 %v1655_v14  ;;  %v973_v14 = vld [vmem:[%s2489_s14] sm:$0xf] }
 0x3ef   :  { %1657 = vmatprep.subr.bf16.mxu1 %v1745_v6 }
 0x3f2   :  { %1659 = vmatpush3.bf16.msra.mxu1 %v1658_v17  ;;  %v1290_v17 = vld [vmem:[%s2490_s11] ss:$0 sm:$0xff] }
 0x485   :  { %v1425_v22 = vpop.f32.mrb[2].mxu0 }
 0x486   :  { %v958_v56 = vmul.f32 %v1425_v22, %v942_v19  ;;  %v862_v1 = vpop.f32.mrb[3].mxu0 }
 0x487   :  { %v957_v53 = vmul.f32 %v941_v20, %v862_v1 }
 0x489   :  { %v1613_v9 = vpack.c.bf16 %v958_v56, %v957_v53  ;;  %v1236_v56 = vmul.f32 %v2054_v51, %v2054_v51 }
 0x48a   :  { %v1428_v61 = vpop.f32.mrb[4].mxu0 }
 0x48b   :  { %v960_v63 = vmul.f32 %v1428_v61, %v944_v24  ;;  %v872_v29 = vpop.f32.mrb[5].mxu0  ;;  %1614 = vmatpush3.bf16.msra.mxu0 %v1613_v9  ;;  %v1237_v53 = vsel %vm1138_vm6, %v1236_v56, 0.0 }
 0x48c   :  { %v959_v10 = vmul.f32 %v943_v27, %v872_v29  ;;  %1615 = vmatprep.subr.bf16.mxu0 %v1745_v6 }
 0x48e   :  { %v1616_v30 = vpack.c.bf16 %v960_v63, %v959_v10 }
 0x490   :  { %1617 = vmatpush3.bf16.msra.mxu0 %v1616_v30 }
 0x491   :  { %v1431_v15 = vpop.f32.mrb[6].mxu0  ;;  %1618 = vmatprep.subr.bf16.mxu0 %v1745_v6 }
 0x492   :  { %v962_v5 = vmul.f32 %v1431_v15, %v946_v32  ;;  %v882_v35 = vpop.f32.mrb[7].mxu0 }
 0x493   :  { %v961_v36 = vmul.f32 %v945_v23, %v882_v35 }
 0x495   :  { %v1619_v18 = vpack.c.bf16 %v962_v5, %v961_v36 }
 0x497   :  { %1620 = vmatpush3.bf16.msra.mxu0 %v1619_v18 }
 0x498   :  { %1621 = vmatprep.subr.bf16.mxu0 %v1745_v6 }
 0x499   :  { %v1434_v40 = vpop.f32.mrb[8].mxu0 }
 0x49a   :  { %v964_v33 = vmul.f32 %v1434_v40, %v948_v38  ;;  %v892_v26 = vpop.f32.mrb[9].mxu0 }
 0x49b   :  { %v963_v42 = vmul.f32 %v947_v25, %v892_v26 }
 0x49d   :  { %v1622_v28 = vpack.c.bf16 %v964_v33, %v963_v42 }
 0x49f   :  { %1623 = vmatpush3.bf16.msra.mxu0 %v1622_v28 }
 0x4a0   :  { %1624 = vmatprep.subr.bf16.mxu0 %v1745_v6 }
 0x4a1   :  { %v1437_v45 = vpop.f32.mrb[10].mxu0 }
 0x4a2   :  { %v966_v39 = vmul.f32 %v1437_v45, %v950_v46  ;;  %v902_v50 = vpop.f32.mrb[11].mxu0 }
 0x4a3   :  { %v965_v52 = vmul.f32 %v949_v47, %v902_v50 }
 0x4a5   :  { %v1625_v49 = vpack.c.bf16 %v966_v39, %v965_v52  ;;  %v1440_v54 = vpop.f32.mrb[12].mxu0 }
 0x4a6   :  { %v968_v55 = vmul.f32 %v1440_v54, %v952_v31  ;;  %v912_v34 = vpop.f32.mrb[13].mxu0 }
 0x4a7   :  { %v967_v37 = vmul.f32 %v951_v44, %v912_v34  ;;  %1626 = vmatpush3.bf16.msra.mxu0 %v1625_v49 }
 0x4a8   :  { %1627 = vmatprep.subr.bf16.mxu0 %v1745_v6 }
 0x4a9   :  { %v1628_v58 = vpack.c.bf16 %v968_v55, %v967_v37  ;;  %v1443_v60 = vpop.f32.mrb[14].mxu0 }
 0x4aa   :  { %v970_v48 = vmul.f32 %v1443_v60, %v954_v43  ;;  %v922_v0 = vpop.f32.mrb[15].mxu0 }
 0x4ab   :  { %v969_v2 = vmul.f32 %v953_v41, %v922_v0  ;;  %1629 = vmatpush3.bf16.msra.mxu0 %v1628_v58 }
 0x4ac   :  { %1630 = vmatprep.subr.bf16.mxu0 %v1745_v6 }
 0x4ad   :  { %v1631_v4 = vpack.c.bf16 %v970_v48, %v969_v2  ;;  %v1446_v21 = vpop.f32.mrb[16].mxu0 }
 0x4ae   :  { %v972_v59 = vmul.f32 %v1446_v21, %v956_v57  ;;  %v932_v8 = vpop.f32.mrb[17].mxu0 }
 0x4af   :  { %v971_v11 = vmul.f32 %v955_v3, %v932_v8  ;;  %1632 = vmatpush3.bf16.msra.mxu0 %v1631_v4 }
 0x4b0   :  { %1633 = vmatprep.subr.bf16.mxu0 %v1745_v6 }
 0x4b1   :  { %v1634_v12 = vpack.c.bf16 %v972_v59, %v971_v11 }
 0x4b3   :  { %1635 = vmatpush3.bf16.msra.mxu0 %v1634_v12 }
 0x4b4   :  { %1517 = vmatprep.subr.mxu0 %v1747_v13 }
 0x4b6   :  { %1480 = vmatmul.mubr.f32.vlgmr.msra.gmra.mrb[18].mxu0 %v973_v14 }
 0x4b7   :  { %1519 = vmatprep.mubr.msk.f32.mxu0 %vm1746_vm0, %v1747_v13  ;;  %v1141_v13 = vpop.xlane.xlu0 %1140 }
 0x4b8   :  { %1734 = vrsqrt.f32 %v1141_v13  ;;  %vm1148_vm7 = vcmp.eq.f32.partialorder %v1141_v13, inf  ;;  %v1151_v63 = vand.u32 2147483648, %v1141_v13  ;;  %vm1150_vm8 = vcmp.eq.f32.partialorder %v1141_v13, 0.0 }
 0x4c2   :  { %v1735_v9 = vpop.eup %1734 }
 0x4c3   :  { %v1147_v61 = vmul.f32 %v1735_v9, %v1141_v13 }
 0x4c5   :  { %v1149_v29 = vsel %vm1148_vm7, %v1141_v13, %v1147_v61 }
 0x4c6   :  { %v1152_v30 = vsel %vm1150_vm8, %v1151_v63, %v1149_v29 }
 0x4c7   :  { %v1153_v35 = vadd.f32 1e-08, %v1152_v30 }
 0x589   :  { %v1040_v7 = vpop.f32.mrb[18].mxu0 }
 0x58a   :  { %v1481_v16 = vpop.f32.mrb[19].mxu0  ;;  %1515 = vmatmul.mubr.f32.vlgmr.msra.gmra.mrb[26].mxu1 %v1040_v7 }
 0x65d   :  { %v1133_v6 = vpop.f32.mrb[26].mxu1 }
 0x65e   :  { %v1134_v19 = vadd.f32 %v1290_v17, %v1133_v6  ;;  %v1516_v20 = vpop.f32.mrb[27].mxu1 }
 0x660   :  { %v1142_v22 = vmul.f32 %v1134_v19, %v1134_v19 }
 0x662   :  { %v1143_v1 = vsel %vm1138_vm6, %v1142_v22, 0.0 }
 0x663   :  { %1144 = vadd.xlane.f32.xlu1 %v1143_v1 }
 0x667   :  { %1238 = vadd.xlane.f32.xlu1 %v1237_v53 }
 0x6f0   :  { %v1145_v24 = vpop.xlane.xlu1 %1144 }
 0x6f1   :  { %1736 = vrsqrt.f32 %v1145_v24  ;;  %vm1158_vm9 = vcmp.eq.f32.partialorder %v1145_v24, inf  ;;  %v1161_v23 = vand.u32 2147483648, %v1145_v24  ;;  %vm1160_vm10 = vcmp.eq.f32.partialorder %v1145_v24, 0.0 }
 0x6f4   :  { %v1239_v27 = vpop.xlane.xlu1 %1238 }
 0x6f5   :  { %1738 = vrsqrt.f32 %v1239_v27 }
 0x6fb   :  { %v1737_v10 = vpop.eup %1736 }
 0x6fc   :  { %v1157_v32 = vmul.f32 %v1737_v10, %v1145_v24  ;;  %v1241_v38 = vmul.f32 %v1737_v10, %v1134_v19 }
 0x6fe   :  { %v1159_v15 = vsel %vm1158_vm9, %v1145_v24, %v1157_v32 }
 0x6ff   :  { %v1739_v5 = vpop.eup %1738  ;;  %v1162_v36 = vsel %vm1160_vm10, %v1161_v23, %v1159_v15 }
 0x700   :  { %v1163_v18 = vadd.f32 1e-08, %v1162_v36  ;;  %v1243_v25 = vmul.f32 %v1739_v5, %v2054_v51 }
 0x702   :  { %1740 = vrcp.f32 %v1163_v18  ;;  %v1244_v40 = vmul.f32 %v1243_v25, %v1241_v38 }
 0x703   :  { %1742 = vrcp.f32 %v1153_v35 }
 0x704   :  { %v1245_v33 = vsel %vm1138_vm6, %v1244_v40, 0.0 }
 0x705   :  { %1246 = vadd.xlane.f32.xlu0 %v1245_v33 }
 0x70c   :  { %v1741_v26 = vpop.eup %1740 }
 0x70d   :  { %v1743_v42 = vpop.eup %1742  ;;  %v1165_v28 = vmul.f32 %v1741_v26, %v1134_v19 }
 0x70e   :  { %v1155_v46 = vmul.f32 %v1743_v42, %v2305_v62 }
 0x70f   :  { %1518 = vmatpush3.xpose.msra.mxu0 %v1165_v28 }
 0x712   :  { %1520 = vmatmul.mubr.f32.vlgmr.msra.gmra.mrb[20].mxu0 %v1155_v46 }
 0x792   :  { %v1247_v47 = vpop.xlane.xlu0 %1246 }
 0x793   :  { %v1249_v45 = vsel %vm1248_vm11, %v1247_v47, 0.0 }
 0x794   :  { %1250 = vadd.xlane.f32.xlu1 %v1249_v45 }
 0x7e5   :  { %v1232_v39 = vpop.f32.mrb[20].mxu0 }
 0x7e6   :  { %1263 = vst.msk [vmem:[%s2491_s15] sm:$0xf] %vm1262_vm12, %v1232_v39  ;;  %v1521_v51 = vpop.f32.mrb[21].mxu0 }
 0x821   :  { %v1251_v50 = vpop.xlane.xlu1 %1250 }
 0x822   :  { %v1252_v52 = vrot.slane %v1251_v50, 4 }
 0x824   :  { %v1253_v31 = vadd.f32 %v1252_v52, %v1251_v50 }
 0x826   :  { %v1254_v44 = vrot.slane %v1253_v31, 2 }
 0x828   :  { %v1255_v49 = vadd.f32 %v1254_v44, %v1253_v31 }
 0x82a   :  { %v1256_v54 = vrot.slane %v1255_v49, 1 }
 0x82c   :  { %v1257_v55 = vadd.f32 %v1256_v54, %v1255_v49 }
 0x82e   :  { %1660 = vpush %v1257_v55 }
 0x85f   :  { %s1661_s3 = spop %1660 }
 0x860   :  { %v1259_v62 = vstv %s1661_s3 }
 0x861   :  { %v1260_v34 = vmul.f32 0.25, %v1259_v62 }
 0x863   :  { %v1261_v37 = vsub.f32 1.0, %v1260_v34 }
 0x865   :  { %1265 = vst.msk [vmem:[%s2491_s15 + $0x4] sm:$0x1] %vm1264_vm13, %v1261_v37 }

</bundles_post_ra>
